<compile_context>
chip_gen: v6e
topology: v6e:2x2x1
jax: 0.10.0
libtpu: 0.0.40
codegen_flags: <defaults>
</compile_context>

<pallas_src>
import functools

import jax
import jax.numpy as jnp
from jax import lax
from jax.experimental import pallas as pl
from jax.experimental.pallas import tpu as pltpu


def _loss_kernel(pred_ref, label_ref, mean_ref, inv_std_ref, out_ref, *,
                 tile_rows, acc_rows, feat, total_rows, tiles_per_split,
                 num_full_tiles, needs_mask):
    c = pl.program_id(0)   # batch split (parallel; one per TensorCore on v7x)
    i = pl.program_id(1)   # row-tile within split (arbitrary; reduction)

    @pl.when(i == 0)
    def _init():
        out_ref[...] = jnp.zeros_like(out_ref)

    pred = pred_ref[...].astype(jnp.float32)          # (TB, D)
    label = label_ref[...].astype(jnp.float32)        # (TB, D)
    mean = mean_ref[...].astype(jnp.float32)          # (1,  D) -> broadcast
    inv_std = inv_std_ref[...].astype(jnp.float32)    # (1,  D) -> broadcast

    diff = pred - (label - mean) * inv_std
    sq = diff * diff                                  # (TB, D)

    groups = tile_rows // acc_rows

    def _accumulate(x):
        # Elementwise (VALU-only) partial reduce down to (acc_rows, D),
        # then a tiny read-modify-write of the resident output block.
        if groups > 1:
            x = jnp.sum(x.reshape(groups, acc_rows, feat), axis=0)
        out_ref[...] += x[None]

    if needs_mask:
        tile_idx = c * tiles_per_split + i
        is_full = tile_idx < num_full_tiles

        @pl.when(is_full)
        def _full():
            _accumulate(sq)

        @pl.when(jnp.logical_not(is_full))
        def _ragged():
            # Only ragged / overshoot tiles pay for the iota + select.
            rows = (lax.broadcasted_iota(jnp.int32, sq.shape, 0)
                    + tile_idx * tile_rows)
            _accumulate(jnp.where(rows < total_rows, sq, 0.0))
    else:
        _accumulate(sq)


def loss_label_mean_std_normalized(pred_pose, label_pose, pose_mean, pose_std,
                                   weight=1.0, *, max_tile_rows=None):
    """Pallas implementation of LossLabelMeanStdNormalized.forward (subjects=False)."""
    B, D = pred_pose.shape

    # ---- row-tile from a VMEM budget (2 inputs x 2 pipeline buffers) -------
    in_row_bytes = 2 * D * (pred_pose.dtype.itemsize + label_pose.dtype.itemsize)
    budget = 8 * 1024 * 1024              # conservative: fits v7x (64 MiB VMEM)
    cap = max(32, min(4096, (budget // in_row_bytes) // 32 * 32))  # multiple of 32
    if max_tile_rows is not None:
        cap = min(cap, max_tile_rows)

    if B <= cap:
        TB = B                            # single tile == full dim (exempt from 8-rule)
        num_tiles = 1
    else:
        TB = cap                          # multiple of 32
        num_tiles = -(-B // TB)

    acc_rows = 8 if TB % 8 == 0 else TB
    ragged = (B % TB) != 0

    # Split batch across two cores when there is more than one tile (v7x win,
    # harmless on v5e/v6e since the outer axis is simply iterated).
    nsplit = 2 if num_tiles >= 2 else 1
    tiles_per_split = -(-num_tiles // nsplit)
    overshoot = nsplit * tiles_per_split > num_tiles
    needs_mask = ragged or overshoot
    num_full_tiles = B // TB

    # mean / 1/std as [1, D] f32 rows (broadcast inside the kernel is free;
    # the exact reciprocal is computed once on D elements in the wrapper).
    mean_row = jnp.reshape(pose_mean, (1, D)).astype(jnp.float32)
    inv_std_row = jnp.reshape(1.0 / pose_std.astype(jnp.float32), (1, D))

    last_tile = num_tiles - 1
    if overshoot:
        def data_map(c, i):
            # Clamp overshoot tiles onto the last real tile (valid DMA);
            # their contribution is zeroed by the in-kernel row mask.
            return (jnp.minimum(c * tiles_per_split + i, last_tile), 0)
    else:
        def data_map(c, i):
            return (c * tiles_per_split + i, 0)

    kernel = functools.partial(
        _loss_kernel, tile_rows=TB, acc_rows=acc_rows, feat=D, total_rows=B,
        tiles_per_split=tiles_per_split, num_full_tiles=num_full_tiles,
        needs_mask=needs_mask)

    bytes_in = (pred_pose.size * pred_pose.dtype.itemsize
                + label_pose.size * label_pose.dtype.itemsize
                + 2 * D * 4)
    cost = pl.CostEstimate(flops=5 * B * D, transcendentals=0,
                           bytes_accessed=bytes_in + nsplit * acc_rows * D * 4)

    partials = pl.pallas_call(
        kernel,
        out_shape=jax.ShapeDtypeStruct((nsplit, acc_rows, D), jnp.float32),
        grid=(nsplit, tiles_per_split),
        in_specs=[
            pl.BlockSpec((TB, D), data_map),            # pred tile
            pl.BlockSpec((TB, D), data_map),            # label tile
            pl.BlockSpec((1, D), lambda c, i: (0, 0)),  # mean row
            pl.BlockSpec((1, D), lambda c, i: (0, 0)),  # inv_std row
        ],
        out_specs=pl.BlockSpec((1, acc_rows, D), lambda c, i: (c, 0, 0)),
        compiler_params=pltpu.CompilerParams(
            dimension_semantics=("parallel", "arbitrary"),
            vmem_limit_bytes=32 * 1024 * 1024),
        cost_estimate=cost,
    )(pred_pose, label_pose, mean_row, inv_std_row)

    # weight and 1/n applied here so `weight` may be a traced scalar.
    return (weight / (B * D)) * jnp.sum(partials)


def _reference(pred_pose, label_pose, pose_mean, pose_std, weight=1.0):
    label_norm = (label_pose - pose_mean) / pose_std
    return weight * jnp.mean((pred_pose - label_norm) ** 2)


if __name__ == "__main__":
    key = jax.random.PRNGKey(0)
    k1, k2, k3, k4 = jax.random.split(key, 4)

    # Small shape consistent with the module: batch of 8, 17 joints * 3 coords.
    B, D = 8, 51
    pred_pose = jax.random.normal(k1, (B, D), dtype=jnp.float32)
    label_pose = jax.random.normal(k2, (B, D), dtype=jnp.float32) * 2.0 + 0.5
    pose_mean = jax.random.normal(k3, (D,), dtype=jnp.float32) * 0.1
    pose_std = jax.random.uniform(k4, (D,), dtype=jnp.float32,
                                  minval=0.5, maxval=1.5)

    loss = jax.block_until_ready(
        loss_label_mean_std_normalized(pred_pose, label_pose,
                                       pose_mean, pose_std, 1.0))
    ref = _reference(pred_pose, label_pose, pose_mean, pose_std, 1.0)
    assert jnp.allclose(loss, ref, rtol=1e-5, atol=1e-5), (loss, ref)

    # Also exercise the tiled / ragged / dual-split path on a larger batch by
    # forcing a small row tile (TB=32 -> 3 real tiles + 1 overshoot tile).
    B2 = 80
    pred2 = jax.random.normal(k1, (B2, D), dtype=jnp.float32)
    label2 = jax.random.normal(k2, (B2, D), dtype=jnp.float32) * 2.0 + 0.5
    loss2 = jax.block_until_ready(
        loss_label_mean_std_normalized(pred2, label2, pose_mean, pose_std, 0.5,
                                       max_tile_rows=32))
    ref2 = _reference(pred2, label2, pose_mean, pose_std, 0.5)
    assert jnp.allclose(loss2, ref2, rtol=1e-5, atol=1e-5), (loss2, ref2)

    print("KERNEL_OK")
</pallas_src>

<mosaic_0001>
module attributes {stable_mosaic.version = 11 : i64} {
  func.func @_loss_kernel(%arg0: i32, %arg1: i32, %arg2: memref<8x51xf32, #tpu.memory_space<vmem>>, %arg3: memref<8x51xf32, #tpu.memory_space<vmem>>, %arg4: memref<1x51xf32, #tpu.memory_space<vmem>>, %arg5: memref<1x51xf32, #tpu.memory_space<vmem>>, %arg6: memref<1x8x51xf32, #tpu.memory_space<vmem>>) attributes {dimension_semantics = [#tpu.dimension_semantics<parallel>, #tpu.dimension_semantics<arbitrary>], iteration_bounds = array<i64: 1, 1>, scalar_prefetch = 0 : i64, scratch_operands = 0 : i64, tpu.core_type = #tpu.core_type<tc>, window_params = [{transform_indices = @transform_0, window_bounds = array<i64: 8, 51>}, {transform_indices = @transform_1, window_bounds = array<i64: 8, 51>}, {pipeline_mode = #tpu.pipeline_mode<synchronous>, transform_indices = @transform_2, window_bounds = array<i64: 1, 51>}, {pipeline_mode = #tpu.pipeline_mode<synchronous>, transform_indices = @transform_3, window_bounds = array<i64: 1, 51>}, {transform_indices = @transform_4, window_bounds = array<i64: 1, 8, 51>}]} {
    %c0_i32 = arith.constant 0 : i32
    %0 = arith.cmpi eq, %arg1, %c0_i32 : i32
    %1 = arith.extui %0 : i1 to i32
    %c0_i32_0 = arith.constant 0 : i32
    %2 = arith.cmpi ne, %1, %c0_i32_0 : i32
    scf.if %2 {
      %cst = arith.constant 0.000000e+00 : f32
      %17 = vector.broadcast %cst : f32 to vector<1x8x51xf32>
      %c0_14 = arith.constant 0 : index
      %c0_15 = arith.constant 0 : index
      %c0_16 = arith.constant 0 : index
      %18 = vector.load %arg6[%c0_14, %c0_15, %c0_16] : memref<1x8x51xf32, #tpu.memory_space<vmem>>, vector<1x8x51xf32>
      tpu.vector_store %arg6[%c0_14, %c0_15, %c0_16], %17 {strides = array<i32>} : memref<1x8x51xf32, #tpu.memory_space<vmem>>, vector<1x8x51xf32>,
    } else {
    }
    %c0 = arith.constant 0 : index
    %c0_1 = arith.constant 0 : index
    %3 = vector.load %arg2[%c0, %c0_1] : memref<8x51xf32, #tpu.memory_space<vmem>>, vector<8x51xf32>
    %c0_2 = arith.constant 0 : index
    %c0_3 = arith.constant 0 : index
    %4 = vector.load %arg3[%c0_2, %c0_3] : memref<8x51xf32, #tpu.memory_space<vmem>>, vector<8x51xf32>
    %c0_4 = arith.constant 0 : index
    %c0_5 = arith.constant 0 : index
    %5 = vector.load %arg4[%c0_4, %c0_5] : memref<1x51xf32, #tpu.memory_space<vmem>>, vector<1x51xf32>
    %c0_6 = arith.constant 0 : index
    %c0_7 = arith.constant 0 : index
    %6 = vector.load %arg5[%c0_6, %c0_7] : memref<1x51xf32, #tpu.memory_space<vmem>>, vector<1x51xf32>
    %7 = vector.broadcast %5 : vector<1x51xf32> to vector<8x51xf32>
    %8 = arith.subf %4, %7 : vector<8x51xf32>
    %9 = vector.broadcast %6 : vector<1x51xf32> to vector<8x51xf32>
    %10 = arith.mulf %8, %9 : vector<8x51xf32>
    %11 = arith.subf %3, %10 : vector<8x51xf32>
    %12 = arith.mulf %11, %11 : vector<8x51xf32>
    %c0_8 = arith.constant 0 : index
    %c0_9 = arith.constant 0 : index
    %c0_10 = arith.constant 0 : index
    %13 = vector.load %arg6[%c0_8, %c0_9, %c0_10] : memref<1x8x51xf32, #tpu.memory_space<vmem>>, vector<1x8x51xf32>
    %14 = vector.shape_cast %12 : vector<8x51xf32> to vector<1x8x51xf32>
    %15 = arith.addf %13, %14 : vector<1x8x51xf32>
    %c0_11 = arith.constant 0 : index
    %c0_12 = arith.constant 0 : index
    %c0_13 = arith.constant 0 : index
    %16 = vector.load %arg6[%c0_11, %c0_12, %c0_13] : memref<1x8x51xf32, #tpu.memory_space<vmem>>, vector<1x8x51xf32>
    tpu.vector_store %arg6[%c0_11, %c0_12, %c0_13], %15 {strides = array<i32>} : memref<1x8x51xf32, #tpu.memory_space<vmem>>, vector<1x8x51xf32>,
    return
  }
  func.func @transform_0(%arg0: i32, %arg1: i32) -> (i32, i32) {
    %c1_i32 = arith.constant 1 : i32
    %0 = arith.muli %arg0, %c1_i32 : i32
    %1 = arith.addi %0, %arg1 : i32
    %c0_i32 = arith.constant 0 : i32
    %c0_i32_0 = arith.constant 0 : i32
    return %1, %c0_i32 : i32, i32
  }
  func.func @transform_1(%arg0: i32, %arg1: i32) -> (i32, i32) {
    %c1_i32 = arith.constant 1 : i32
    %0 = arith.muli %arg0, %c1_i32 : i32
    %1 = arith.addi %0, %arg1 : i32
    %c0_i32 = arith.constant 0 : i32
    %c0_i32_0 = arith.constant 0 : i32
    return %1, %c0_i32 : i32, i32
  }
  func.func @transform_2(%arg0: i32, %arg1: i32) -> (i32, i32) {
    %c0_i32 = arith.constant 0 : i32
    %c0_i32_0 = arith.constant 0 : i32
    %c0_i32_1 = arith.constant 0 : i32
    return %c0_i32, %c0_i32_0 : i32, i32
  }
  func.func @transform_3(%arg0: i32, %arg1: i32) -> (i32, i32) {
    %c0_i32 = arith.constant 0 : i32
    %c0_i32_0 = arith.constant 0 : i32
    %c0_i32_1 = arith.constant 0 : i32
    return %c0_i32, %c0_i32_0 : i32, i32
  }
  func.func @transform_4(%arg0: i32, %arg1: i32) -> (i32, i32, i32) {
    %c0_i32 = arith.constant 0 : i32
    %c0_i32_0 = arith.constant 0 : i32
    %c0_i32_1 = arith.constant 0 : i32
    return %arg0, %c0_i32, %c0_i32_0 : i32, i32, i32
  }
}

</mosaic_0001>

<bundles_post_ra>
// kernel: tpu_custom_call.1
= control target key start
LH: loop header
LB: loop body
LE: loop exit
PB: predicated region body
PF: predicated region fallthrough
CT: control target
= control target key end

     0   :  { %9 = vsyncpa [#allocation3], 0  ;;  %s214_s0 = inlined_call_operand.hbm [shape: f32[8,51], index: 0, kind: input, shape index: {}]   ;;  %s215_s1 = inlined_call_operand.hbm [shape: f32[8,51], index: 1, kind: input, shape index: {}]   ;;  %s216_s2 = inlined_call_operand.vmem [shape: f32[1,51], index: 2, kind: input, shape index: {}]   ;;  %s217_s3 = inlined_call_operand.vmem [shape: f32[1,51], index: 3, kind: input, shape index: {}]   ;;  %s218_s4 = inlined_call_operand.hbm [shape: f32[1,8,51], index: 4, kind: output, shape index: {}]  }
   0x1   :  { %10 = vsyncpa [#allocation6], 0 }
   0x2   :  { %11 = vsyncpa [#allocation4], 0  ;;  %s168_s15 = smov [#allocation2]   ;;  %s169_s17 = smov [#allocation5]  }
   0x3   :  { %s21_s16 = sshll.u32 %s168_s15, 4  ;;  %s34_s18 = sshll.u32 %s169_s17, 4  ;;  %s22_s16 = int_to_ptr.vmem [resolvable:$true] %s21_s16  ;;  %s35_s18 = int_to_ptr.vmem [resolvable:$true] %s34_s18 }
   0x4   :  { %s110_s19 = scalar_lea.vmem %s22_s16, 128  ;;  %p115_p1 = scmp.lt.s32.totalorder %s22_s16, %s22_s16 }
   0x5   :  { %p111_p0 = scmp.ne.s32.totalorder %s22_s16, %s110_s19  ;;  %p116_p2 = scmp.lt.s32.totalorder %s110_s19, %s110_s19 }
   0x7   :  { %p117_p3 = por %p116_p2, %p115_p1 }
   0x9   :  { %p118_p4 = pnand %p117_p3, %p111_p0 }
   0xb   :  { %121 = shalt.err (!%p118_p4)
}
   0xc   :  { %24 = dma.hbm_to_vmem [thread:$0]  %s214_s0, 128, %s22_s16, [#allocation3]  }
   0xd   :  { %s130_s22 = scalar_lea.vmem %s35_s18, 128  ;;  %p135_p6 = scmp.lt.s32.totalorder %s35_s18, %s35_s18 }
   0xe   :  { %p131_p5 = scmp.ne.s32.totalorder %s35_s18, %s130_s22  ;;  %p136_p7 = scmp.lt.s32.totalorder %s130_s22, %s130_s22 }
  0x10   :  { %p137_p8 = por %p136_p7, %p135_p6 }
  0x12   :  { %p138_p9 = pnand %p137_p8, %p131_p5 }
  0x14   :  { %141 = shalt.err (!%p138_p9)
}
  0x15   :  { %37 = dma.hbm_to_vmem [thread:$0]  %s215_s1, 128, %s35_s18, [#allocation6]  }
  0x16   :  { %162 = dma.done.wait [#allocation3], 128  }
  0x17   :  { %163 = vsyncadd [#allocation3], 4294967168 }
  0x18   :  { %164 = dma.done.wait [#allocation6], 128  }
  0x19   :  { %165 = vsyncadd [#allocation6], 4294967168  ;;  %vm54_vm0 = vcmask 416768   ;;  %v170_v0 = vmov 0.0   ;;  %v57_v1 = vld [vmem:[#allocation5] sm:$0xff]  ;;  %v56_v5 = vld [vmem:[#allocation2] sm:$0xff] }
  0x1a   :  { %55 = vst.msk [vmem:[#allocation7] sm:$0xff] %vm54_vm0, %v170_v0  ;;  %v96_v2 = vld [vmem:[%s216_s2] ss:$0 sm:$0xff]  ;;  %s171_s1 = smov [#allocation7]  }
  0x1b   :  { %v97_v3 = vld [vmem:[%s217_s3] ss:$0 sm:$0xff]  ;;  %v66_v4 = vsub.f32 %v57_v1, %v96_v2  ;;  %s86_s28 = sshll.u32 %s171_s1, 4  ;;  %s87_s28 = int_to_ptr.vmem [resolvable:$true] %s86_s28 }
  0x1c   :  { %s142_s29 = scalar_lea.vmem %s87_s28, 128  ;;  %p147_p11 = scmp.lt.s32.totalorder %s87_s28, %s87_s28 }
  0x1d   :  { %v73_v6 = vmul.f32 %v97_v3, %v66_v4  ;;  %p143_p10 = scmp.ne.s32.totalorder %s87_s28, %s142_s29  ;;  %p148_p12 = scmp.lt.s32.totalorder %s142_s29, %s142_s29 }
  0x1f   :  { %v74_v7 = vsub.f32 %v56_v5, %v73_v6  ;;  %p149_p13 = por %p148_p12, %p147_p11 }
  0x21   :  { %v76_v8 = vld [vmem:[#allocation7] sm:$0xff]  ;;  %v75_v9 = vmul.f32 %v74_v7, %v74_v7  ;;  %p150_p0 = pnand %p149_p13, %p143_p10 }
  0x23   :  { %v77_v10 = vadd.f32 %v76_v8, %v75_v9 }
  0x25   :  { %79 = vst.msk [vmem:[#allocation7] sm:$0xff] %vm54_vm0, %v77_v10 }
  0x26   :  { %153 = shalt.err (!%p150_p0)
}
  0x27   :  { %89 = dma.vmem_to_hbm [thread:$0]  %s87_s28, 128, %s218_s4, [#allocation4]  }
  0x28   :  { %166 = dma.done.wait [#allocation4], 128  }
  0x29   :  { %167 = vsyncadd [#allocation4], 4294967168 }
  0x2a   :  { %93 = vsyncpa [#allocation3], 1 }
  0x2b   :  { %94 = vsyncpa [#allocation6], 1 }
  0x2c   :  { %95 = vsyncpa [#allocation4], 1 }

</bundles_post_ra>
